<compile_context>
chip_gen: v6e
topology: v6e:2x2x1
jax: 0.10.0
libtpu: 0.0.40
codegen_flags: <defaults>
</compile_context>

<pallas_src>
import jax
import jax.numpy as jnp
from jax.experimental import pallas as pl
from jax.experimental.pallas import tpu as pltpu


def _rope_kernel(offset_ref, inv_freq_ref, out_ref):
    # offset_ref:   (1,)        int32, SMEM (scalar prefetch)
    # inv_freq_ref: (1, dim)    f32,   VMEM (inv_freq duplicated across both halves)
    # out_ref:      (tile, dim) f32,   VMEM
    tile_seq, _ = out_ref.shape
    base_row = offset_ref[0] + pl.program_id(0) * tile_seq           # int32 scalar
    pos_i32 = jax.lax.broadcasted_iota(jnp.int32, out_ref.shape, 0) + base_row
    pos = pos_i32.astype(jnp.float32)                                # (tile, dim)
    # emb = concat([freqs, freqs], -1) == pos * [inv_freq, inv_freq]
    out_ref[...] = pos * inv_freq_ref[...]                           # one lane-dense store


def qwen_rotary_embedding(max_seq_len, dim, *, base=10000, offset=0, ntk_alpha=1.0):
    """Returns the rotary position embedding of shape (1, max_seq_len, 1, dim), f32."""
    assert dim % 2 == 0, "dim must be even"

    # --- parameter setup (plain JAX glue): NTK-adjusted inverse frequencies ---
    base_ntk = base * (ntk_alpha ** (dim / (dim - 2)))
    exponents = jnp.arange(0, dim, 2, dtype=jnp.float32) / dim
    inv_freq = 1.0 / (base_ntk ** exponents)                         # (dim//2,)
    # Duplicate so the kernel writes the full lane width in one store.
    inv_freq_dup = jnp.concatenate([inv_freq, inv_freq], axis=-1)    # (dim,)
    inv_freq_dup = inv_freq_dup.reshape(1, dim).astype(jnp.float32)

    # Runtime scalar: offset lives in SMEM via scalar prefetch (no recompiles
    # when offset changes between decode steps).
    offset_arr = jnp.asarray([offset], dtype=jnp.int32)

    # Tile the sequence axis: constant VMEM footprint, pipelined HBM stores.
    # 512 rows is past the ~85%-of-roofline knee for tiled stores and keeps
    # the double-buffered output well under the scoped VMEM limit for any
    # realistic head dim.
    if max_seq_len <= 512:
        tile_seq = max_seq_len          # block == full array extent -> always legal
    else:
        tile_seq = 512                  # multiple of 8 sublanes; last block may be partial
    num_tiles = pl.cdiv(max_seq_len, tile_seq)

    emb = pl.pallas_call(
        _rope_kernel,
        out_shape=jax.ShapeDtypeStruct((max_seq_len, dim), jnp.float32),
        grid_spec=pltpu.PrefetchScalarGridSpec(
            num_scalar_prefetch=1,
            grid=(num_tiles,),
            in_specs=[pl.BlockSpec((1, dim), lambda i, off: (0, 0))],
            out_specs=pl.BlockSpec((tile_seq, dim), lambda i, off: (i, 0)),
        ),
        compiler_params=pltpu.CompilerParams(
            dimension_semantics=("parallel",),
        ),
    )(offset_arr, inv_freq_dup)

    # rearrange 'n d -> 1 n 1 d' (rank-only change; free for contiguous data)
    return emb.reshape(1, max_seq_len, 1, dim)


def _reference(max_seq_len, dim, *, base=10000, offset=0, ntk_alpha=1.0):
    base_ntk = base * (ntk_alpha ** (dim / (dim - 2)))
    inv_freq = 1.0 / (base_ntk ** (jnp.arange(0, dim, 2, dtype=jnp.float32) / dim))
    seqlen = max_seq_len + offset
    cached = max(2 * seqlen, 16)
    seq = jnp.arange(cached, dtype=jnp.float32)
    freqs = jnp.outer(seq, inv_freq)
    emb = jnp.concatenate([freqs, freqs], axis=-1)
    emb = emb.reshape(1, cached, 1, dim)
    return emb[:, offset:offset + max_seq_len]


if __name__ == "__main__":
    # Deterministic "inputs": the module's forward takes only scalars.
    key = jax.random.PRNGKey(0)  # no tensor inputs needed; kept for determinism convention

    # Small case matching the module-implied shapes.
    max_seq_len = 8
    dim = 32
    offset = 2
    ntk_alpha = 1.0

    out = qwen_rotary_embedding(max_seq_len, dim, base=10000,
                                offset=offset, ntk_alpha=ntk_alpha)
    out = jax.block_until_ready(out)
    ref = _reference(max_seq_len, dim, base=10000,
                     offset=offset, ntk_alpha=ntk_alpha)
    assert out.shape == (1, max_seq_len, 1, dim), out.shape
    assert out.dtype == jnp.float32
    assert jnp.allclose(out, ref, rtol=1e-6, atol=1e-6), "mismatch vs reference (small)"

    # Second check: exercises the multi-tile path (partial last block) and a
    # lane-dense dim=128 output, plus nontrivial ntk_alpha.
    max_seq_len2, dim2, offset2, ntk2 = 520, 128, 3, 2.0
    out2 = qwen_rotary_embedding(max_seq_len2, dim2, base=10000,
                                 offset=offset2, ntk_alpha=ntk2)
    out2 = jax.block_until_ready(out2)
    ref2 = _reference(max_seq_len2, dim2, base=10000,
                      offset=offset2, ntk_alpha=ntk2)
    assert out2.shape == (1, max_seq_len2, 1, dim2), out2.shape
    assert jnp.allclose(out2, ref2, rtol=1e-5, atol=1e-5), "mismatch vs reference (tiled)"

    print("KERNEL_OK")
</pallas_src>

<mosaic_0001>
module attributes {stable_mosaic.version = 11 : i64} {
  func.func @_rope_kernel(%arg0: i32, %arg1: memref<1xi32, #tpu.memory_space<smem>>, %arg2: memref<1x32xf32, #tpu.memory_space<vmem>>, %arg3: memref<8x32xf32, #tpu.memory_space<vmem>>) attributes {dimension_semantics = [#tpu.dimension_semantics<parallel>], iteration_bounds = array<i64: 1>, scalar_prefetch = 1 : i64, scratch_operands = 0 : i64, tpu.core_type = #tpu.core_type<tc>, window_params = [{pipeline_mode = #tpu.pipeline_mode<synchronous>, transform_indices = @transform_0, window_bounds = array<i64: 1, 32>}, {transform_indices = @transform_1, window_bounds = array<i64: 8, 32>}]} {
    %c0 = arith.constant 0 : index
    %0 = memref.load %arg1[%c0] : memref<1xi32, #tpu.memory_space<smem>>
    %c8_i32 = arith.constant 8 : i32
    %1 = arith.muli %arg0, %c8_i32 : i32
    %2 = arith.addi %0, %1 : i32
    %3 = tpu.iota {dimensions = array<i32: 0>} : vector<8x32xi32>
    %4 = vector.broadcast %2 : i32 to vector<8x32xi32>
    %5 = arith.addi %3, %4 : vector<8x32xi32>
    %6 = arith.sitofp %5 : vector<8x32xi32> to vector<8x32xf32>
    %c0_0 = arith.constant 0 : index
    %c0_1 = arith.constant 0 : index
    %7 = vector.load %arg2[%c0_0, %c0_1] : memref<1x32xf32, #tpu.memory_space<vmem>>, vector<1x32xf32>
    %8 = vector.broadcast %7 : vector<1x32xf32> to vector<8x32xf32>
    %9 = arith.mulf %6, %8 : vector<8x32xf32>
    %c0_2 = arith.constant 0 : index
    %c0_3 = arith.constant 0 : index
    %10 = vector.load %arg3[%c0_2, %c0_3] : memref<8x32xf32, #tpu.memory_space<vmem>>, vector<8x32xf32>
    tpu.vector_store %arg3[%c0_2, %c0_3], %9 {strides = array<i32>} : memref<8x32xf32, #tpu.memory_space<vmem>>, vector<8x32xf32>,
    return
  }
  func.func @transform_0(%arg0: i32, %arg1: memref<1xi32, #tpu.memory_space<smem>>) -> (i32, i32) {
    %c0_i32 = arith.constant 0 : i32
    %c0_i32_0 = arith.constant 0 : i32
    %c0_i32_1 = arith.constant 0 : i32
    return %c0_i32, %c0_i32_0 : i32, i32
  }
  func.func @transform_1(%arg0: i32, %arg1: memref<1xi32, #tpu.memory_space<smem>>) -> (i32, i32) {
    %c0_i32 = arith.constant 0 : i32
    %c0_i32_0 = arith.constant 0 : i32
    return %arg0, %c0_i32 : i32, i32
  }
}

</mosaic_0001>

<bundles_post_ra>
// kernel: tpu_custom_call.1
= control target key start
LH: loop header
LB: loop body
LE: loop exit
PB: predicated region body
PF: predicated region fallthrough
CT: control target
= control target key end

     0   :  { %v14_v0 = vlaneseq  ;;  %s92_s0 = inlined_call_operand.<no memory space> [shape: s32[1], index: 0, kind: input, shape index: {}]   ;;  %s93_s1 = inlined_call_operand.vmem [shape: f32[1,32], index: 1, kind: input, shape index: {}]   ;;  %s94_s2 = inlined_call_operand.hbm [shape: f32[8,32], index: 2, kind: output, shape index: {}]  }
   0x1   :  { %8 = vsyncpa [#allocation5], 0  ;;  %v16_v1 = vstv %s92_s0  ;;  %v43_v4 = vld [vmem:[%s93_s1] ss:$0 sm:$0xff]  ;;  %s67_s13 = smov [#allocation4]   ;;  %vm27_vm0 = vcmask 261120  }
   0x2   :  { %v15_v2 = vshrl.u32 %v14_v0, 7  ;;  %s35_s14 = sshll.u32 %s67_s13, 4  ;;  %s36_s14 = int_to_ptr.vmem [resolvable:$true] %s35_s14 }
   0x3   :  { %s45_s15 = scalar_lea.vmem %s36_s14, 128  ;;  %p50_p1 = scmp.lt.s32.totalorder %s36_s14, %s36_s14 }
   0x4   :  { %v17_v3 = vadd.s32 %v16_v1, %v15_v2  ;;  %p46_p0 = scmp.ne.s32.totalorder %s36_s14, %s45_s15  ;;  %p51_p2 = scmp.lt.s32.totalorder %s45_s15, %s45_s15 }
   0x6   :  { %v18_v5 = vcvt.s32.f32 %v17_v3  ;;  %p52_p3 = por %p51_p2, %p50_p1 }
   0x8   :  { %v26_v6 = vmul.f32 %v43_v4, %v18_v5  ;;  %p53_p4 = pnand %p52_p3, %p46_p0 }
   0xa   :  { %28 = vst.msk [vmem:[#allocation4] sm:$0xff] %vm27_vm0, %v26_v6 }
   0xb   :  { %56 = shalt.err (!%p53_p4)
}
   0xc   :  { %38 = dma.vmem_to_hbm [thread:$0]  %s36_s14, 128, %s94_s2, [#allocation5]  }
   0xd   :  { %65 = dma.done.wait [#allocation5], 128  }
   0xe   :  { %66 = vsyncadd [#allocation5], 4294967168 }
   0xf   :  { %42 = vsyncpa [#allocation5], 1 }

</bundles_post_ra>
